<compile_context>
chip_gen: v5e
topology: v5e:2x2
jax: 0.10.0
libtpu: 0.0.40
codegen_flags: <defaults>
</compile_context>

<pallas_src>
import functools

import jax
import jax.numpy as jnp
from jax.experimental import pallas as pl
from jax.experimental.pallas import tpu as pltpu


def _round_up(x: int, m: int) -> int:
    return ((x + m - 1) // m) * m


def _make_kernel(n_hidden_layers: int, n_extra_adv_layers: int,
                 num_classes: int, has_adversary: bool):
    """Kernel: ReLU hiddens -> fused [sigmoid-head | first-adversary] matmul ->
    remaining adversary ReLU layers -> sensitive head -> one lane-dense sigmoid store."""

    def kernel(*refs):
        # ref order:
        #   x,
        #   (Wh_i, bh_i) * n_hidden_layers,
        #   W_fused, b_fused,                       # [softmax | adv0]  (or [softmax | cls] if no adversary layers)
        #   (Wa_i, ba_i) * n_extra_adv_layers,      # adversary layers 1..
        #   (Wc, bc)                                # only if has_adversary
        #   out  (TILE_B, num_classes + 1)
        idx = 0
        x_ref = refs[idx]; idx += 1

        h = x_ref[...].astype(jnp.float32)
        for _ in range(n_hidden_layers):
            w_ref = refs[idx]; b_ref = refs[idx + 1]; idx += 2
            h = jnp.dot(h, w_ref[...], preferred_element_type=jnp.float32) + b_ref[...]
            h = jnp.maximum(h, 0.0)  # ReLU

        # Fused head matmul: both the sigmoid head and the first adversary layer
        # consume h, so they share a single MXU pass.
        wf_ref = refs[idx]; bf_ref = refs[idx + 1]; idx += 2
        fused = jnp.dot(h, wf_ref[...], preferred_element_type=jnp.float32) + bf_ref[...]
        logits = fused[:, :num_classes]

        if has_adversary:
            # grad_reverse(h) is identity in the forward pass.
            a = jnp.maximum(fused[:, num_classes:], 0.0)  # ReLU of first adversary layer
            for _ in range(n_extra_adv_layers):
                w_ref = refs[idx]; b_ref = refs[idx + 1]; idx += 2
                a = jnp.dot(a, w_ref[...], preferred_element_type=jnp.float32) + b_ref[...]
                a = jnp.maximum(a, 0.0)
            wc_ref = refs[idx]; bc_ref = refs[idx + 1]; idx += 2
            cls_logits = (jnp.dot(a, wc_ref[...], preferred_element_type=jnp.float32)
                          + bc_ref[...])
        else:
            cls_logits = fused[:, num_classes:]

        out_ref = refs[idx]
        all_logits = jnp.concatenate([logits, cls_logits], axis=-1)
        out_ref[...] = jax.nn.sigmoid(all_logits).astype(out_ref.dtype)

    return kernel


def init_adv_debiasing_params(key, n_features, num_classes=1,
                              hidden_layers=(60,), adversary_layers=(50,)):
    """Init mimicking PyTorch nn.Linear default (U(-1/sqrt(fan_in), +1/sqrt(fan_in))).

    Weights are stored already transposed to (in, out); biases as (1, out)."""
    def linear(key, fan_in, fan_out):
        kw, kb = jax.random.split(key)
        bound = 1.0 / jnp.sqrt(float(fan_in))
        w = jax.random.uniform(kw, (fan_in, fan_out), jnp.float32, -bound, bound)
        b = jax.random.uniform(kb, (1, fan_out), jnp.float32, -bound, bound)
        return w, b

    params = {}
    num_neurons = [n_features] + list(hidden_layers)
    keys = jax.random.split(key, len(hidden_layers) + 1 + len(adversary_layers) + 1)
    k_iter = iter(keys)

    params["hiddens"] = [linear(next(k_iter), num_neurons[i], num_neurons[i + 1])
                         for i in range(len(hidden_layers))]
    params["softmax"] = linear(next(k_iter), num_neurons[-1], num_classes)

    num_adv = [num_neurons[-1]] + list(adversary_layers)
    params["adversaries"] = [linear(next(k_iter), num_adv[i], num_adv[i + 1])
                             for i in range(len(adversary_layers))]
    params["sensitive_cls"] = linear(next(k_iter), num_adv[-1], 1)
    return params


@functools.partial(jax.jit, static_argnames=("tile_b",))
def adv_debiasing_forward(x, params, *, tile_b=512):
    """x: (B, n_features) float32.

    Returns (logprobs (B, num_classes), cls (B, 1)) — elementwise sigmoid outputs,
    matching the PyTorch module."""
    B, F = x.shape

    hiddens = params["hiddens"]
    ws, bs = params["softmax"]
    advs = params["adversaries"]
    wc, bc = params["sensitive_cls"]
    num_classes = ws.shape[1]
    has_adv = len(advs) > 0

    # Fuse the sigmoid head with the first adversary layer (both consume h).
    if has_adv:
        wa0, ba0 = advs[0]
        w_fused = jnp.concatenate([ws, wa0], axis=1)
        b_fused = jnp.concatenate([bs, ba0], axis=1)
        extra_advs = advs[1:]
    else:
        w_fused = jnp.concatenate([ws, wc], axis=1)
        b_fused = jnp.concatenate([bs, bc], axis=1)
        extra_advs = []

    flat_params = []
    for w, b in hiddens:
        flat_params += [w, b]
    flat_params += [w_fused, b_fused]
    for w, b in extra_advs:
        flat_params += [w, b]
    if has_adv:
        flat_params += [wc, bc]

    # Batch tiling: sublane-aligned tile, batch padded to a whole number of tiles.
    tile = min(tile_b, _round_up(B, 8))
    tile = _round_up(tile, 8)
    b_pad = _round_up(B, tile)
    if b_pad != B:
        x = jnp.pad(x, ((0, b_pad - B), (0, 0)))
    grid = (b_pad // tile,)

    kernel = _make_kernel(
        n_hidden_layers=len(hiddens),
        n_extra_adv_layers=len(extra_advs),
        num_classes=num_classes,
        has_adversary=has_adv,
    )

    out_width = num_classes + 1

    # x and output stream per grid step; weights/biases stay resident (constant index_map).
    x_spec = pl.BlockSpec((tile, F), lambda i: (i, 0))
    param_specs = [pl.BlockSpec(p.shape, lambda i: (0, 0)) for p in flat_params]
    out_spec = pl.BlockSpec((tile, out_width), lambda i: (i, 0))

    # Advisory cost estimate for XLA's scheduler.
    weight_shapes = [p.shape for p in flat_params[0::2]]
    flops = sum(2 * b_pad * wi * wo for (wi, wo) in weight_shapes)
    param_bytes = sum(int(p.size) * p.dtype.itemsize for p in flat_params)
    bytes_accessed = (b_pad * F * x.dtype.itemsize
                      + b_pad * out_width * 4
                      + param_bytes)
    transcendentals = b_pad * out_width  # sigmoid exps

    out = pl.pallas_call(
        kernel,
        out_shape=jax.ShapeDtypeStruct((b_pad, out_width), jnp.float32),
        grid=grid,
        in_specs=[x_spec] + param_specs,
        out_specs=out_spec,
        compiler_params=pltpu.CompilerParams(
            dimension_semantics=("parallel",),
        ),
        cost_estimate=pl.CostEstimate(
            flops=int(flops),
            transcendentals=int(transcendentals),
            bytes_accessed=int(bytes_accessed),
        ),
    )(x, *flat_params)

    logprobs = out[:B, :num_classes]
    cls = out[:B, num_classes:]
    return logprobs, cls


def _reference_forward(x, params):
    h = x
    for w, b in params["hiddens"]:
        h = jax.nn.relu(h @ w + b)
    logprobs = jax.nn.sigmoid(h @ params["softmax"][0] + params["softmax"][1])
    a = h  # grad_reverse is identity in the forward pass
    for w, b in params["adversaries"]:
        a = jax.nn.relu(a @ w + b)
    cls = jax.nn.sigmoid(a @ params["sensitive_cls"][0] + params["sensitive_cls"][1])
    return logprobs, cls


if __name__ == "__main__":
    # Module-consistent small shapes: n_features=16, hidden=[60], adversary=[50], num_classes=1.
    # Batch 256 with tile_b=128 exercises the batch grid (2 steps) and padding-free path.
    B, n_features = 256, 16
    hidden_layers = (60,)
    adversary_layers = (50,)
    num_classes = 1

    key = jax.random.PRNGKey(0)
    kx, kp = jax.random.split(key)
    x = jax.random.normal(kx, (B, n_features), jnp.float32)

    params = init_adv_debiasing_params(kp, n_features, num_classes,
                                       hidden_layers, adversary_layers)

    logprobs, cls = adv_debiasing_forward(x, params, tile_b=128)
    jax.block_until_ready((logprobs, cls))

    ref_logprobs, ref_cls = _reference_forward(x, params)
    assert logprobs.shape == (B, num_classes) and cls.shape == (B, 1)
    assert jnp.allclose(logprobs, ref_logprobs, atol=1e-5, rtol=1e-5)
    assert jnp.allclose(cls, ref_cls, atol=1e-5, rtol=1e-5)

    # Also exercise a non-divisible batch (partial-tile padding path).
    B2 = 100
    x2 = jax.random.normal(kx, (B2, n_features), jnp.float32)
    lp2, cls2 = adv_debiasing_forward(x2, params, tile_b=128)
    jax.block_until_ready((lp2, cls2))
    rlp2, rcls2 = _reference_forward(x2, params)
    assert jnp.allclose(lp2, rlp2, atol=1e-5, rtol=1e-5)
    assert jnp.allclose(cls2, rcls2, atol=1e-5, rtol=1e-5)

    print("KERNEL_OK")
</pallas_src>

<mosaic_0001>
module attributes {stable_mosaic.version = 11 : i64} {
  func.func @kernel(%arg0: i32, %arg1: memref<128x16xf32, #tpu.memory_space<vmem>>, %arg2: memref<16x60xf32, #tpu.memory_space<vmem>>, %arg3: memref<1x60xf32, #tpu.memory_space<vmem>>, %arg4: memref<60x51xf32, #tpu.memory_space<vmem>>, %arg5: memref<1x51xf32, #tpu.memory_space<vmem>>, %arg6: memref<50x1xf32, #tpu.memory_space<vmem>>, %arg7: memref<1x1xf32, #tpu.memory_space<vmem>>, %arg8: memref<128x2xf32, #tpu.memory_space<vmem>>) attributes {dimension_semantics = [#tpu.dimension_semantics<parallel>], iteration_bounds = array<i64: 2>, scalar_prefetch = 0 : i64, scratch_operands = 0 : i64, tpu.core_type = #tpu.core_type<tc>, window_params = [{transform_indices = @transform_0, window_bounds = array<i64: 128, 16>}, {pipeline_mode = #tpu.pipeline_mode<synchronous>, transform_indices = @transform_1, window_bounds = array<i64: 16, 60>}, {pipeline_mode = #tpu.pipeline_mode<synchronous>, transform_indices = @transform_2, window_bounds = array<i64: 1, 60>}, {pipeline_mode = #tpu.pipeline_mode<synchronous>, transform_indices = @transform_3, window_bounds = array<i64: 60, 51>}, {pipeline_mode = #tpu.pipeline_mode<synchronous>, transform_indices = @transform_4, window_bounds = array<i64: 1, 51>}, {pipeline_mode = #tpu.pipeline_mode<synchronous>, transform_indices = @transform_5, window_bounds = array<i64: 50, 1>}, {pipeline_mode = #tpu.pipeline_mode<synchronous>, transform_indices = @transform_6, window_bounds = array<i64: 1, 1>}, {transform_indices = @transform_7, window_bounds = array<i64: 128, 2>}]} {
    %c0 = arith.constant 0 : index
    %c0_0 = arith.constant 0 : index
    %0 = vector.load %arg1[%c0, %c0_0] : memref<128x16xf32, #tpu.memory_space<vmem>>, vector<128x16xf32>
    %c0_1 = arith.constant 0 : index
    %c0_2 = arith.constant 0 : index
    %1 = vector.load %arg2[%c0_1, %c0_2] : memref<16x60xf32, #tpu.memory_space<vmem>>, vector<16x60xf32>
    %cst = arith.constant dense<0.000000e+00> : vector<128x60xf32>
    %2 = tpu.matmul %0, %1, %cst {dimension_numbers = #tpu.dot_dimension_numbers<[1], [0], [0], [1], [0, 0, 1, 1], [], []>} : vector<128x16xf32>, vector<16x60xf32>, vector<128x60xf32> -> vector<128x60xf32>
    %c0_3 = arith.constant 0 : index
    %c0_4 = arith.constant 0 : index
    %3 = vector.load %arg3[%c0_3, %c0_4] : memref<1x60xf32, #tpu.memory_space<vmem>>, vector<1x60xf32>
    %4 = vector.broadcast %3 : vector<1x60xf32> to vector<128x60xf32>
    %5 = arith.addf %2, %4 : vector<128x60xf32>
    %cst_5 = arith.constant 0.000000e+00 : f32
    %6 = vector.broadcast %cst_5 : f32 to vector<128x60xf32>
    %7 = arith.maximumf %5, %6 : vector<128x60xf32>
    %c0_6 = arith.constant 0 : index
    %c0_7 = arith.constant 0 : index
    %8 = vector.load %arg4[%c0_6, %c0_7] : memref<60x51xf32, #tpu.memory_space<vmem>>, vector<60x51xf32>
    %cst_8 = arith.constant dense<0.000000e+00> : vector<128x51xf32>
    %9 = tpu.matmul %7, %8, %cst_8 {dimension_numbers = #tpu.dot_dimension_numbers<[1], [0], [0], [1], [0, 0, 1, 1], [], []>} : vector<128x60xf32>, vector<60x51xf32>, vector<128x51xf32> -> vector<128x51xf32>
    %c0_9 = arith.constant 0 : index
    %c0_10 = arith.constant 0 : index
    %10 = vector.load %arg5[%c0_9, %c0_10] : memref<1x51xf32, #tpu.memory_space<vmem>>, vector<1x51xf32>
    %11 = vector.broadcast %10 : vector<1x51xf32> to vector<128x51xf32>
    %12 = arith.addf %9, %11 : vector<128x51xf32>
    %13 = vector.extract_strided_slice %12 {offsets = [0, 0], sizes = [128, 1], strides = [1, 1]} : vector<128x51xf32> to vector<128x1xf32>
    %14 = vector.extract_strided_slice %12 {offsets = [0, 1], sizes = [128, 50], strides = [1, 1]} : vector<128x51xf32> to vector<128x50xf32>
    %cst_11 = arith.constant 0.000000e+00 : f32
    %15 = vector.broadcast %cst_11 : f32 to vector<128x50xf32>
    %16 = arith.maximumf %14, %15 : vector<128x50xf32>
    %c0_12 = arith.constant 0 : index
    %c0_13 = arith.constant 0 : index
    %17 = vector.load %arg6[%c0_12, %c0_13] : memref<50x1xf32, #tpu.memory_space<vmem>>, vector<50x1xf32>
    %cst_14 = arith.constant dense<0.000000e+00> : vector<128x1xf32>
    %18 = tpu.matmul %16, %17, %cst_14 {dimension_numbers = #tpu.dot_dimension_numbers<[1], [0], [0], [1], [0, 0, 1, 1], [], []>} : vector<128x50xf32>, vector<50x1xf32>, vector<128x1xf32> -> vector<128x1xf32>
    %c0_15 = arith.constant 0 : index
    %c0_16 = arith.constant 0 : index
    %19 = vector.load %arg7[%c0_15, %c0_16] : memref<1x1xf32, #tpu.memory_space<vmem>>, vector<1x1xf32>
    %20 = vector.broadcast %19 : vector<1x1xf32> to vector<128x1xf32>
    %21 = arith.addf %18, %20 : vector<128x1xf32>
    %22 = tpu.concatenate %13, %21 in 1 : vector<128x1xf32>, vector<128x1xf32> -> vector<128x2xf32>
    %23 = arith.negf %22 : vector<128x2xf32>
    %24 = math.exp %23 : vector<128x2xf32>
    %cst_17 = arith.constant 1.000000e+00 : f32
    %25 = vector.broadcast %cst_17 : f32 to vector<128x2xf32>
    %26 = arith.addf %25, %24 : vector<128x2xf32>
    %27 = arith.divf %25, %26 : vector<128x2xf32>
    %c0_18 = arith.constant 0 : index
    %c0_19 = arith.constant 0 : index
    %28 = vector.load %arg8[%c0_18, %c0_19] : memref<128x2xf32, #tpu.memory_space<vmem>>, vector<128x2xf32>
    tpu.vector_store %arg8[%c0_18, %c0_19], %27 {strides = array<i32>} : memref<128x2xf32, #tpu.memory_space<vmem>>, vector<128x2xf32>,
    return
  }
  func.func @transform_0(%arg0: i32) -> (i32, i32) {
    %c0_i32 = arith.constant 0 : i32
    %c0_i32_0 = arith.constant 0 : i32
    return %arg0, %c0_i32 : i32, i32
  }
  func.func @transform_1(%arg0: i32) -> (i32, i32) {
    %c0_i32 = arith.constant 0 : i32
    %c0_i32_0 = arith.constant 0 : i32
    %c0_i32_1 = arith.constant 0 : i32
    return %c0_i32, %c0_i32_0 : i32, i32
  }
  func.func @transform_2(%arg0: i32) -> (i32, i32) {
    %c0_i32 = arith.constant 0 : i32
    %c0_i32_0 = arith.constant 0 : i32
    %c0_i32_1 = arith.constant 0 : i32
    return %c0_i32, %c0_i32_0 : i32, i32
  }
  func.func @transform_3(%arg0: i32) -> (i32, i32) {
    %c0_i32 = arith.constant 0 : i32
    %c0_i32_0 = arith.constant 0 : i32
    %c0_i32_1 = arith.constant 0 : i32
    return %c0_i32, %c0_i32_0 : i32, i32
  }
  func.func @transform_4(%arg0: i32) -> (i32, i32) {
    %c0_i32 = arith.constant 0 : i32
    %c0_i32_0 = arith.constant 0 : i32
    %c0_i32_1 = arith.constant 0 : i32
    return %c0_i32, %c0_i32_0 : i32, i32
  }
  func.func @transform_5(%arg0: i32) -> (i32, i32) {
    %c0_i32 = arith.constant 0 : i32
    %c0_i32_0 = arith.constant 0 : i32
    %c0_i32_1 = arith.constant 0 : i32
    return %c0_i32, %c0_i32_0 : i32, i32
  }
  func.func @transform_6(%arg0: i32) -> (i32, i32) {
    %c0_i32 = arith.constant 0 : i32
    %c0_i32_0 = arith.constant 0 : i32
    %c0_i32_1 = arith.constant 0 : i32
    return %c0_i32, %c0_i32_0 : i32, i32
  }
  func.func @transform_7(%arg0: i32) -> (i32, i32) {
    %c0_i32 = arith.constant 0 : i32
    %c0_i32_0 = arith.constant 0 : i32
    return %arg0, %c0_i32 : i32, i32
  }
}

</mosaic_0001>

<bundles_post_ra>
// kernel: adv_debiasing_forward.1
= control target key start
LH: loop header
LB: loop body
LE: loop exit
PB: predicated region body
PF: predicated region fallthrough
CT: control target
= control target key end

     0   :  { %s1425_s26 = smov 0   ;;  %s1772_s0 = inlined_call_operand.vmem [shape: f32[256,16], index: 0, kind: input, shape index: {}]   ;;  %s1773_s1 = inlined_call_operand.vmem [shape: f32[16,60], index: 1, kind: input, shape index: {}]   ;;  %s1774_s2 = inlined_call_operand.vmem [shape: f32[1,60], index: 2, kind: input, shape index: {}]   ;;  %s1775_s3 = inlined_call_operand.vmem [shape: f32[60,51], index: 3, kind: input, shape index: {}]   ;;  %s1776_s4 = inlined_call_operand.vmem [shape: f32[1,51], index: 4, kind: input, shape index: {}]   ;;  %s1777_s5 = inlined_call_operand.vmem [shape: f32[50,1], index: 5, kind: input, shape index: {}]   ;;  %s1778_s6 = inlined_call_operand.<no memory space> [shape: f32[1,1], index: 6, kind: input, shape index: {}]   ;;  %s1779_s7 = inlined_call_operand.vmem [shape: f32[256,2], index: 7, kind: output, shape index: {}]  }
   0x1   :  { %v12_v0 = vstv %s1778_s6 }
   0x2   :  { %13 = vst [vmem:[#allocation2] sm:$0x1] %v12_v0 }
   0x3 LB: > { %s1201_s27 = sadd.s32 4294967295, %s1378_s26   ;;  %p1205_p0 = scmp.ge.s32.totalorder %s1378_s26, 1  ;;  %s1378_s26 = sphi %s1425_s26, %s19_s26  }
   0x4   : > { %p240_p1 = scmp.lt.s32.totalorder %s1378_s26, 3 }
   0x6   : > { %p241_p2 = pnand %p1205_p0, %p240_p1 }
   0x7   : > { %s1206_s8 = sshll.u32 (!%p241_p2), %s1201_s27, 4  ;;  %s1381_s28 = smov (!%p241_p2), 1  }
   0x8   : > { %244 = sbr.rel (%p241_p2) target bundleno = 799 (0x31f), region = 48  ;;  %p273_p3 = scmp.lt.s32.totalorder (!%p241_p2), %s1206_s8, 31 }
   0xd   : > { %v301_v1 = vld [vmem:[%s1773_s1 + $0x8] sm:$0xff]  ;;  %v300_v2 = vld [vmem:[%s1773_s1] sm:$0xff]  ;;  %s1781_s8 = smov (!%p273_p3, %s1206_s8), 31  ;;  %vm306_vm0 = vcmask 130048   ;;  %vm497_vm1 = vcmask 1043456   ;;  %v442_v14 = vld [vmem:[%s1775_s3 + $0x30] sm:$0xff] }
   0xe   : > { %369 = vmatpush.msra.mxu0 %v301_v1  ;;  %1278 = vmatpush.msra.mxu3 %v301_v1  ;;  %s1207_s9 = sshll.u32 %s1781_s8, 3  ;;  %v443_v13 = vld [vmem:[%s1775_s3 + $0x38] sm:$0xf]  ;;  %v441_v15 = vld [vmem:[%s1775_s3 + $0x28] sm:$0xff]  ;;  %v440_v17 = vld [vmem:[%s1775_s3 + $0x20] sm:$0xff]  ;;  %vm448_vm2 = vcmask 490496  }
   0xf   : > { %s1447_s12 = scalar_lea.vmem %s1772_s0, %s1207_s9  ;;  %1226 = vmatpush.msk.msra.mxu1 %vm497_vm1, %v443_v13  ;;  %v439_v19 = vld [vmem:[%s1775_s3 + $0x18] sm:$0xff]  ;;  %v438_v23 = vld [vmem:[%s1775_s3 + $0x10] sm:$0xff]  ;;  %v437_v25 = vld [vmem:[%s1775_s3 + $0x8] sm:$0xff]  ;;  %vm674_vm3 = vcmask 1041408   ;;  %vm641_vm4 = vcmask 408576   ;;  %vm807_vm5 = vcmask 7168   ;;  %s1707_s30 = scalar_lea.vmem %s1779_s7, %s1207_s9 }
  0x10   : > { %370 = vmatpush.msra.mxu0 %v300_v2  ;;  %1279 = vmatpush.msra.mxu3 %v300_v2  ;;  %v284_v3 = vld [vmem:[%s1447_s12] sm:$0xff]  ;;  %v285_v4 = vld [vmem:[%s1447_s12 + $0x8] sm:$0xff]  ;;  %v286_v5 = vld [vmem:[%s1447_s12 + $0x10] sm:$0xff]  ;;  %vm1128_vm8 = vcmask 15360  }
  0x11   : > { %1210 = vmatmul.msk.f32.vlgmr.msra.gmra.mxu0 %vm306_vm0, %v284_v3  ;;  %v287_v6 = vld [vmem:[%s1447_s12 + $0x18] sm:$0xff]  ;;  %v288_v7 = vld [vmem:[%s1447_s12 + $0x20] sm:$0xff]  ;;  %v289_v8 = vld [vmem:[%s1447_s12 + $0x28] sm:$0xff]  ;;  %510 = vmatpush.msra.mxu1 %v442_v14 }
  0x12   : > { %v290_v9 = vld [vmem:[%s1447_s12 + $0x30] sm:$0xff]  ;;  %v291_v10 = vld [vmem:[%s1447_s12 + $0x38] sm:$0xff]  ;;  %v292_v11 = vld [vmem:[%s1447_s12 + $0x40] sm:$0xff]  ;;  %1280 = vmatpush.msk.msrb.mxu3 %vm497_vm1, %v443_v13 }
  0x13   : > { %v297_v12 = vld [vmem:[%s1447_s12 + $0x68] sm:$0xff]  ;;  %v298_v18 = vld [vmem:[%s1447_s12 + $0x70] sm:$0xff]  ;;  %511 = vmatpush.msra.mxu1 %v441_v15  ;;  %v299_v21 = vld [vmem:[%s1447_s12 + $0x78] sm:$0xff] }
  0x14   : > { %1223 = vmatmul.msk.f32.vlgmr.msra.gmra.mxu3 %vm306_vm0, %v297_v12  ;;  %v293_v16 = vld [vmem:[%s1447_s12 + $0x48] sm:$0xff]  ;;  %v294_v20 = vld [vmem:[%s1447_s12 + $0x50] sm:$0xff]  ;;  %v295_v22 = vld [vmem:[%s1447_s12 + $0x58] sm:$0xff] }
  0x15   : > { %1281 = vmatpush.msrb.mxu3 %v442_v14  ;;  %512 = vmatpush.msra.mxu1 %v440_v17  ;;  %v296_v24 = vld [vmem:[%s1447_s12 + $0x60] sm:$0xff]  ;;  %s1380_s12 = smov 127  }
  0x16   : > { %v436_v26 = vld [vmem:[%s1775_s3] sm:$0xff] }
  0x17   : > { %1282 = vmatpush.msrb.mxu3 %v441_v15  ;;  %513 = vmatpush.msra.mxu1 %v439_v19  ;;  %v1508_v27 = vld [vmem:[%s1774_s2] ss:$0 sm:$0xff] }
  0x18   : > { %v1545_v12 = vld [vmem:[%s1776_s4] ss:$0 sm:$0xff] }
  0x19   : > { %1211 = vmatmul.msk.f32.gmra.mxu0 %vm306_vm0, %v285_v4  ;;  %1283 = vmatpush.msrb.mxu3 %v440_v17 }
  0x1a   : > { %514 = vmatpush.msra.mxu1 %v438_v23 }
  0x1b   : > { %1284 = vmatpush.msrb.mxu3 %v439_v19 }
  0x1c   : > { %1224 = vmatmul.msk.f32.gmra.mxu3 %vm306_vm0, %v298_v18  ;;  %515 = vmatpush.msra.mxu1 %v437_v25 }
  0x1d   : > { %1285 = vmatpush.msrb.mxu3 %v438_v23 }
  0x1e   : > { %516 = vmatpush.msra.mxu1 %v436_v26 }
  0x1f   : > { %1286 = vmatpush.msrb.mxu3 %v437_v25 }
  0x21   : > { %1212 = vmatmul.msk.f32.gmra.mxu0 %vm306_vm0, %v286_v5  ;;  %1287 = vmatpush.msrb.mxu3 %v436_v26 }
  0x24   : > { %1225 = vmatmul.msk.f32.gmra.mxu3 %vm306_vm0, %v299_v21 }
  0x29   : > { %1213 = vmatmul.msk.f32.gmra.mxu0 %vm306_vm0, %v287_v6 }
  0x31   : > { %1214 = vmatmul.msk.f32.gmra.mxu0 %vm306_vm0, %v288_v7 }
  0x39   : > { %1215 = vmatmul.msk.f32.gmra.mxu0 %vm306_vm0, %v289_v8 }
  0x41   : > { %1216 = vmatmul.msk.f32.gmra.mxu0 %vm306_vm0, %v290_v9 }
  0x49   : > { %1217 = vmatmul.msk.f32.gmra.mxu0 %vm306_vm0, %v291_v10 }
  0x51   : > { %1218 = vmatmul.msk.f32.gmra.mxu0 %vm306_vm0, %v292_v11 }
  0x59   : > { %1219 = vmatmul.msk.f32.gmra.mxu0 %vm306_vm0, %v293_v16 }
  0x61   : > { %1220 = vmatmul.msk.f32.gmra.mxu0 %vm306_vm0, %v294_v20 }
  0x69   : > { %1221 = vmatmul.msk.f32.gmra.mxu0 %vm306_vm0, %v295_v22 }
  0x71   : > { %1222 = vmatmul.msk.f32.gmra.mxu0 %vm306_vm0, %v296_v24 }
  0x8e   : > { %v372_v28 = vpop.f32.mrf.mxu0 }
  0x8f   : > { %v373_v29 = vadd.f32 %v1508_v27, %v372_v28 }
  0x91   : > { %v420_v30 = vmax.f32 %v373_v29, 0.0 }
  0x93   : > { %1227 = vmatmul.msk.f32.vlgmr.msra.gmra.mxu1 %vm448_vm2, %v420_v30 }
  0x96   : > { %v375_v31 = vpop.f32.mrf.mxu0 }
  0x97   : > { %v376_v32 = vadd.f32 %v1508_v27, %v375_v31  ;;  %v411_v0 = vpop.f32.mrf.mxu3 }
  0x98   : > { %v412_v4 = vadd.f32 %v1508_v27, %v411_v0 }
  0x99   : > { %v421_v33 = vmax.f32 %v376_v32, 0.0 }
  0x9a   : > { %v433_v6 = vmax.f32 %v412_v4, 0.0 }
  0x9b   : > { %1228 = vmatmul.msk.f32.gmra.mxu1 %vm448_vm2, %v421_v33 }
  0x9e   : > { %v378_v34 = vpop.f32.mrf.mxu0 }
  0x9f   : > { %v379_v35 = vadd.f32 %v1508_v27, %v378_v34  ;;  %v414_v5 = vpop.f32.mrf.mxu3 }
  0xa0   : > { %v415_v7 = vadd.f32 %v1508_v27, %v414_v5 }
  0xa1   : > { %v422_v36 = vmax.f32 %v379_v35, 0.0 }
  0xa2   : > { %v434_v8 = vmax.f32 %v415_v7, 0.0 }
  0xa3   : > { %1229 = vmatmul.msk.f32.gmra.mxu1 %vm448_vm2, %v422_v36 }
  0xa6   : > { %v381_v37 = vpop.f32.mrf.mxu0 }
  0xa7   : > { %v382_v38 = vadd.f32 %v1508_v27, %v381_v37  ;;  %v417_v9 = vpop.f32.mrf.mxu3 }
  0xa8   : > { %v418_v10 = vadd.f32 %v1508_v27, %v417_v9 }
  0xa9   : > { %v423_v39 = vmax.f32 %v382_v38, 0.0 }
  0xaa   : > { %v435_v11 = vmax.f32 %v418_v10, 0.0 }
  0xab   : > { %1230 = vmatmul.msk.f32.gmra.mxu1 %vm448_vm2, %v423_v39 }
  0xae   : > { %v384_v40 = vpop.f32.mrf.mxu0 }
  0xaf   : > { %v385_v41 = vadd.f32 %v1508_v27, %v384_v40 }
  0xb1   : > { %v424_v42 = vmax.f32 %v385_v41, 0.0 }
  0xb3   : > { %1231 = vmatmul.msk.f32.gmra.mxu1 %vm448_vm2, %v424_v42  ;;  %v588_v42 = vld [vmem:[%s1777_s5 + $0x30] sm:$0x3] }
  0xb4   : > { %1243 = vmatpush.msk.msra.mxu2 %vm674_vm3, %v588_v42  ;;  %1288 = vmatpush.msk.msra.mxu3 %vm674_vm3, %v588_v42 }
  0xb6   : > { %v387_v43 = vpop.f32.mrf.mxu0 }
  0xb7   : > { %v388_v44 = vadd.f32 %v1508_v27, %v387_v43 }
  0xb9   : > { %v425_v45 = vmax.f32 %v388_v44, 0.0  ;;  %v587_v44 = vld [vmem:[%s1777_s5 + $0x28] sm:$0xff] }
  0xba   : > { %688 = vmatpush.msra.mxu2 %v587_v44  ;;  %1289 = vmatpush.msra.mxu3 %v587_v44 }
  0xbb   : > { %1232 = vmatmul.msk.f32.gmra.mxu1 %vm448_vm2, %v425_v45  ;;  %v586_v45 = vld [vmem:[%s1777_s5 + $0x20] sm:$0xff] }
  0xbc   : > { %689 = vmatpush.msra.mxu2 %v586_v45  ;;  %1290 = vmatpush.msra.mxu3 %v586_v45 }
  0xbe   : > { %v390_v46 = vpop.f32.mrf.mxu0 }
  0xbf   : > { %v391_v47 = vadd.f32 %v1508_v27, %v390_v46  ;;  %v585_v46 = vld [vmem:[%s1777_s5 + $0x18] sm:$0xff] }
  0xc0   : > { %690 = vmatpush.msra.mxu2 %v585_v46  ;;  %1291 = vmatpush.msra.mxu3 %v585_v46 }
  0xc1   : > { %v426_v48 = vmax.f32 %v391_v47, 0.0  ;;  %v584_v47 = vld [vmem:[%s1777_s5 + $0x10] sm:$0xff] }
  0xc2   : > { %691 = vmatpush.msra.mxu2 %v584_v47  ;;  %1292 = vmatpush.msra.mxu3 %v584_v47 }
  0xc3   : > { %1233 = vmatmul.msk.f32.gmra.mxu1 %vm448_vm2, %v426_v48  ;;  %v583_v48 = vld [vmem:[%s1777_s5 + $0x8] sm:$0xff] }
  0xc4   : > { %692 = vmatpush.msra.mxu2 %v583_v48  ;;  %1293 = vmatpush.msra.mxu3 %v583_v48 }
  0xc6   : > { %v393_v49 = vpop.f32.mrf.mxu0 }
  0xc7   : > { %v394_v50 = vadd.f32 %v1508_v27, %v393_v49  ;;  %v582_v49 = vld [vmem:[%s1777_s5] sm:$0xff] }
  0xc8   : > { %693 = vmatpush.msra.mxu2 %v582_v49  ;;  %1294 = vmatpush.msra.mxu3 %v582_v49 }
  0xc9   : > { %v427_v51 = vmax.f32 %v394_v50, 0.0 }
  0xcb   : > { %1234 = vmatmul.msk.f32.gmra.mxu1 %vm448_vm2, %v427_v51 }
  0xce   : > { %v396_v52 = vpop.f32.mrf.mxu0 }
  0xcf   : > { %v397_v53 = vadd.f32 %v1508_v27, %v396_v52 }
  0xd1   : > { %v428_v54 = vmax.f32 %v397_v53, 0.0 }
  0xd3   : > { %1235 = vmatmul.msk.f32.gmra.mxu1 %vm448_vm2, %v428_v54 }
  0xd6   : > { %v399_v55 = vpop.f32.mrf.mxu0 }
  0xd7   : > { %v400_v56 = vadd.f32 %v1508_v27, %v399_v55 }
  0xd9   : > { %v429_v57 = vmax.f32 %v400_v56, 0.0 }
  0xdb   : > { %1236 = vmatmul.msk.f32.gmra.mxu1 %vm448_vm2, %v429_v57 }
  0xde   : > { %v402_v58 = vpop.f32.mrf.mxu0 }
  0xdf   : > { %v403_v59 = vadd.f32 %v1508_v27, %v402_v58 }
  0xe1   : > { %v430_v60 = vmax.f32 %v403_v59, 0.0 }
  0xe3   : > { %1237 = vmatmul.msk.f32.gmra.mxu1 %vm448_vm2, %v430_v60 }
  0xe6   : > { %v405_v61 = vpop.f32.mrf.mxu0 }
  0xe7   : > { %v406_v62 = vadd.f32 %v1508_v27, %v405_v61 }
  0xe9   : > { %v431_v63 = vmax.f32 %v406_v62, 0.0 }
  0xeb   : > { %1238 = vmatmul.msk.f32.gmra.mxu1 %vm448_vm2, %v431_v63 }
  0xee   : > { %v408_v1 = vpop.f32.mrf.mxu0 }
  0xef   : > { %v409_v2 = vadd.f32 %v1508_v27, %v408_v1 }
  0xf1   : > { %v432_v3 = vmax.f32 %v409_v2, 0.0 }
  0xf3   : > { %1239 = vmatmul.msk.f32.vlgmr.msrb.gmra.mxu3 %vm448_vm2, %v432_v3 }
  0xfb   : > { %1240 = vmatmul.msk.f32.gmra.mxu3 %vm448_vm2, %v433_v6 }
 0x103   : > { %1241 = vmatmul.msk.f32.gmra.mxu3 %vm448_vm2, %v434_v8 }
 0x10b   : > { %1242 = vmatmul.msk.f32.gmra.mxu3 %vm448_vm2, %v435_v11 }
 0x110   : > { %v518_v13 = vpop.f32.mrf.mxu1 }
 0x111   : > { %v1548_v14 = vadd.f32 %v1545_v12, %v518_v13 }
 0x113   : > { %v566_v15 = vmax.f32 %v1548_v14, 0.0 }
 0x115   : > { %609 = vrot.lane.b32.xlu0 %v566_v15, %s1380_s12 }
 0x118   : > { %v521_v16 = vpop.f32.mrf.mxu1 }
 0x119   : > { %v1553_v17 = vadd.f32 %v1545_v12, %v521_v16 }
 0x11b   : > { %v567_v18 = vmax.f32 %v1553_v17, 0.0 }
 0x11d   : > { %611 = vrot.lane.b32.xlu0 %v567_v18, %s1380_s12 }
 0x120   : > { %v524_v19 = vpop.f32.mrf.mxu1 }
 0x121   : > { %v1558_v20 = vadd.f32 %v1545_v12, %v524_v19 }
 0x123   : > { %v568_v21 = vmax.f32 %v1558_v20, 0.0 }
 0x125   : > { %613 = vrot.lane.b32.xlu1 %v568_v21, %s1380_s12 }
 0x128   : > { %v527_v22 = vpop.f32.mrf.mxu1 }
 0x129   : > { %v1563_v23 = vadd.f32 %v1545_v12, %v527_v22 }
 0x12b   : > { %v569_v24 = vmax.f32 %v1563_v23, 0.0 }
 0x12d   : > { %615 = vrot.lane.b32.xlu1 %v569_v24, %s1380_s12  ;;  %v1664_v24 = vld [vmem:[#allocation2] ss:$0 sm:$0xff] }
 0x130   : > { %v530_v25 = vpop.f32.mrf.mxu1 }
 0x131   : > { %v1568_v26 = vadd.f32 %v1545_v12, %v530_v25 }
 0x133   : > { %v570_v27 = vmax.f32 %v1568_v26, 0.0 }
 0x135   : > { %617 = vrot.lane.b32.xlu2 %v570_v27, %s1380_s12 }
 0x138   : > { %v533_v28 = vpop.f32.mrf.mxu1 }
 0x139   : > { %v1573_v29 = vadd.f32 %v1545_v12, %v533_v28 }
 0x13b   : > { %v571_v30 = vmax.f32 %v1573_v29, 0.0 }
 0x13d   : > { %619 = vrot.lane.b32.xlu2 %v571_v30, %s1380_s12 }
 0x140   : > { %v536_v31 = vpop.f32.mrf.mxu1 }
 0x141   : > { %v1578_v32 = vadd.f32 %v1545_v12, %v536_v31 }
 0x143   : > { %v572_v33 = vmax.f32 %v1578_v32, 0.0 }
 0x145   : > { %621 = vrot.lane.b32.xlu0 %v572_v33, %s1380_s12 }
 0x148   : > { %v539_v34 = vpop.f32.mrf.mxu1 }
 0x149   : > { %v1583_v35 = vadd.f32 %v1545_v12, %v539_v34 }
 0x14b   : > { %v573_v36 = vmax.f32 %v1583_v35, 0.0 }
 0x14d   : > { %623 = vrot.lane.b32.xlu1 %v573_v36, %s1380_s12 }
 0x150   : > { %v542_v37 = vpop.f32.mrf.mxu1 }
 0x151   : > { %v1588_v38 = vadd.f32 %v1545_v12, %v542_v37 }
 0x153   : > { %v574_v39 = vmax.f32 %v1588_v38, 0.0 }
 0x155   : > { %625 = vrot.lane.b32.xlu2 %v574_v39, %s1380_s12 }
 0x158   : > { %v545_v40 = vpop.f32.mrf.mxu1 }
 0x159   : > { %v1593_v41 = vadd.f32 %v1545_v12, %v545_v40 }
 0x15b   : > { %v575_v43 = vmax.f32 %v1593_v41, 0.0 }
 0x15d   : > { %627 = vrot.lane.b32.xlu1 %v575_v43, %s1380_s12 }
 0x160   : > { %v548_v52 = vpop.f32.mrf.mxu1 }
 0x161   : > { %v1624_v54 = vadd.f32 %v1545_v12, %v548_v52 }
 0x163   : > { %v576_v57 = vmax.f32 %v1624_v54, 0.0 }
 0x168   : > { %v551_v59 = vpop.f32.mrf.mxu1 }
 0x169   : > { %v1634_v60 = vadd.f32 %v1545_v12, %v551_v59 }
 0x16b   : > { %v577_v0 = vmax.f32 %v1634_v60, 0.0 }
 0x176   : > { %v554_v50 = vpop.f32.mrf.mxu3 }
 0x177   : > { %v1619_v51 = vadd.f32 %v1545_v12, %v554_v50 }
 0x179   : > { %v578_v53 = vmax.f32 %v1619_v51, 0.0 }
 0x17b   : > { %633 = vrot.lane.b32.xlu0 %v578_v53, %s1380_s12 }
 0x17e   : > { %v557_v55 = vpop.f32.mrf.mxu3 }
 0x17f   : > { %v1627_v56 = vadd.f32 %v1545_v12, %v557_v55 }
 0x181   : > { %v579_v58 = vmax.f32 %v1627_v56, 0.0 }
 0x183   : > { %635 = vrot.lane.b32.xlu2 %v579_v58, %s1380_s12  ;;  %629 = vrot.lane.b32.xlu0 %v576_v57, %s1380_s12 }
 0x186   : > { %v560_v61 = vpop.f32.mrf.mxu3 }
 0x187   : > { %v1637_v62 = vadd.f32 %v1545_v12, %v560_v61  ;;  %v610_v63 = vpop.permute.xlu0 %609 }
 0x188   : > { %1244 = vmatmul.msk.f32.vlgmr.msra.gmra.mxu2 %vm641_vm4, %v610_v63 }
 0x189   : > { %v580_v1 = vmax.f32 %v1637_v62, 0.0 }
 0x18b   : > { %631 = vrot.lane.b32.xlu2 %v577_v0, %s1380_s12  ;;  %637 = vrot.lane.b32.xlu1 %v580_v1, %s1380_s12 }
 0x18e   : > { %v563_v2 = vpop.f32.mrf.mxu3 }
 0x18f   : > { %v1645_v3 = vadd.f32 %v1545_v12, %v563_v2  ;;  %v612_v4 = vpop.permute.xlu0 %611  ;;  %v618_v8 = vpop.permute.xlu2 %617 }
 0x190   : > { %1245 = vmatmul.msk.f32.gmra.mxu2 %vm641_vm4, %v612_v4 }
 0x191   : > { %v581_v5 = vmax.f32 %v1645_v3, 0.0 }
 0x193   : > { %639 = vrot.lane.b32.xlu0 %v581_v5, %s1380_s12 }
 0x197   : > { %v614_v6 = vpop.permute.xlu1 %613  ;;  %v620_v9 = vpop.permute.xlu2 %619 }
 0x198   : > { %1246 = vmatmul.msk.f32.gmra.mxu2 %vm641_vm4, %v614_v6 }
 0x19f   : > { %v616_v7 = vpop.permute.xlu1 %615 }
 0x1a0   : > { %1247 = vmatmul.msk.f32.gmra.mxu2 %vm641_vm4, %v616_v7 }
 0x1a8   : > { %1248 = vmatmul.msk.f32.gmra.mxu2 %vm641_vm4, %v618_v8 }
 0x1af   : > { %v626_v12 = vpop.permute.xlu2 %625 }
 0x1b0   : > { %1249 = vmatmul.msk.f32.gmra.mxu2 %vm641_vm4, %v620_v9 }
 0x1b7   : > { %v622_v10 = vpop.permute.xlu0 %621 }
 0x1b8   : > { %1250 = vmatmul.msk.f32.gmra.mxu2 %vm641_vm4, %v622_v10 }
 0x1bf   : > { %v624_v11 = vpop.permute.xlu1 %623 }
 0x1c0   : > { %1251 = vmatmul.msk.f32.gmra.mxu2 %vm641_vm4, %v624_v11 }
 0x1c8   : > { %1252 = vmatmul.msk.f32.gmra.mxu2 %vm641_vm4, %v626_v12 }
 0x1cf   : > { %v628_v13 = vpop.permute.xlu1 %627 }
 0x1d0   : > { %1253 = vmatmul.msk.f32.gmra.mxu2 %vm641_vm4, %v628_v13 }
 0x1dd   : > { %v636_v16 = vpop.permute.xlu2 %635 }
 0x1e5   : > { %v632_v19 = vpop.permute.xlu2 %631 }
 0x1ed   : > { %v634_v15 = vpop.permute.xlu0 %633 }
 0x1ee   : > { %1256 = vmatmul.msk.f32.vlgmr.msra.gmra.mxu3 %vm641_vm4, %v634_v15 }
 0x1f5   : > { %v630_v18 = vpop.permute.xlu0 %629 }
 0x1f6   : > { %1254 = vmatmul.msk.f32.gmra.mxu2 %vm641_vm4, %v630_v18  ;;  %1257 = vmatmul.msk.f32.gmra.mxu3 %vm641_vm4, %v636_v16 }
 0x1fd   : > { %v638_v21 = vpop.permute.xlu1 %637 }
 0x1fe   : > { %1255 = vmatmul.msk.f32.gmra.mxu2 %vm641_vm4, %v632_v19  ;;  %1258 = vmatmul.msk.f32.gmra.mxu3 %vm641_vm4, %v638_v21 }
 0x205   : > { %v640_v22 = vpop.permute.xlu0 %639 }
 0x206   : > { %1259 = vmatmul.msk.f32.gmra.mxu3 %vm641_vm4, %v640_v22 }
 0x20b   : > { %v695_v25 = vpop.f32.mrf.mxu2 }
 0x20c   : > { %v696_v27 = vadd.f32 %v1664_v24, %v695_v25 }
 0x20e   : > { %759 = vrot.lane.b32.xlu1 %v696_v27, %s1381_s28 }
 0x213   : > { %v698_v28 = vpop.f32.mrf.mxu2 }
 0x214   : > { %v699_v30 = vadd.f32 %v1664_v24, %v698_v28 }
 0x216   : > { %761 = vrot.lane.b32.xlu2 %v699_v30, %s1381_s28 }
 0x21b   : > { %v701_v31 = vpop.f32.mrf.mxu2 }
 0x21c   : > { %v702_v33 = vadd.f32 %v1664_v24, %v701_v31 }
 0x21e   : > { %763 = vrot.lane.b32.xlu0 %v702_v33, %s1381_s28 }
 0x223   : > { %v704_v34 = vpop.f32.mrf.mxu2 }
 0x224   : > { %v705_v36 = vadd.f32 %v1664_v24, %v704_v34 }
 0x226   : > { %765 = vrot.lane.b32.xlu1 %v705_v36, %s1381_s28 }
 0x22b   : > { %v707_v37 = vpop.f32.mrf.mxu2 }
 0x22c   : > { %v708_v39 = vadd.f32 %v1664_v24, %v707_v37 }
 0x22e   : > { %767 = vrot.lane.b32.xlu2 %v708_v39, %s1381_s28 }
 0x233   : > { %v710_v40 = vpop.f32.mrf.mxu2 }
 0x234   : > { %v711_v42 = vadd.f32 %v1664_v24, %v710_v40 }
 0x236   : > { %769 = vrot.lane.b32.xlu0 %v711_v42, %s1381_s28 }
 0x23b   : > { %v713_v43 = vpop.f32.mrf.mxu2 }
 0x23c   : > { %v714_v44 = vadd.f32 %v1664_v24, %v713_v43 }
 0x23e   : > { %771 = vrot.lane.b32.xlu1 %v714_v44, %s1381_s28 }
 0x243   : > { %v716_v45 = vpop.f32.mrf.mxu2 }
 0x244   : > { %v717_v46 = vadd.f32 %v1664_v24, %v716_v45 }
 0x246   : > { %773 = vrot.lane.b32.xlu2 %v717_v46, %s1381_s28 }
 0x24b   : > { %v719_v47 = vpop.f32.mrf.mxu2 }
 0x24c   : > { %v720_v48 = vadd.f32 %v1664_v24, %v719_v47 }
 0x24e   : > { %775 = vrot.lane.b32.xlu0 %v720_v48, %s1381_s28 }
 0x253   : > { %v722_v49 = vpop.f32.mrf.mxu2 }
 0x254   : > { %v723_v50 = vadd.f32 %v1664_v24, %v722_v49 }
 0x256   : > { %777 = vrot.lane.b32.xlu1 %v723_v50, %s1381_s28 }
 0x270   : > { %v762_v52 = vpop.permute.xlu2 %761 }
 0x271   : > { %v809_v53 = vsel %vm807_vm5, %v1553_v17, %v762_v52  ;;  %v731_v55 = vpop.f32.mrf.mxu3 }
 0x272   : > { %v1261_v57 = vmul.f32 -1.442695, %v809_v53  ;;  %v732_v58 = vadd.f32 %v1664_v24, %v731_v55 }
 0x274   : > { %1308 = vpow2.f32 %v1261_v57  ;;  %783 = vrot.lane.b32.xlu1 %v732_v58, %s1381_s28 }
 0x279   : > { %v725_v59 = vpop.f32.mrf.mxu2  ;;  %v734_v61 = vpop.f32.mrf.mxu3 }
 0x27a   : > { %v1309_v63 = vpop.eup %1308  ;;  %v726_v0 = vadd.f32 %v1664_v24, %v725_v59  ;;  %v735_v6 = vadd.f32 %v1664_v24, %v734_v61 }
 0x27b   : > { %v873_v1 = vadd.f32 1.0, %v1309_v63 }
 0x27c   : > { %779 = vrot.lane.b32.xlu2 %v726_v0, %s1381_s28 }
 0x27d   : > { %1310 = vrcp.f32 %v873_v1  ;;  %v914_v12 = vand.u32 2147483648, %v873_v1  ;;  %vm908_vm7 = vweird.f32 %v873_v1 }
 0x27f   : > { %v915_v28 = vor.u32 1.1754944e-38, %v914_v12 }
 0x280   : > { %v760_v2 = vpop.permute.xlu1 %759 }
 0x281   : > { %v808_v17 = vsel %vm807_vm5, %v1548_v14, %v760_v2  ;;  %v728_v4 = vpop.f32.mrf.mxu2  ;;  %v737_v5 = vpop.f32.mrf.mxu3  ;;  %v912_v14 = vand.u32 2147483647, %v873_v1 }
 0x282   : > { %v1260_v7 = vmul.f32 -1.442695, %v808_v17  ;;  %v729_v8 = vadd.f32 %v1664_v24, %v728_v4  ;;  %v738_v22 = vadd.f32 %v1664_v24, %v737_v5 }
 0x283   : > { %v1311_v9 = vpop.eup %1310  ;;  %vm913_vm10 = vcmp.eq.f32.partialorder %v912_v14, 8.507059e+37 }
 0x284   : > { %v904_v10 = vmul.f32 %v1311_v9, %v873_v1  ;;  %1312 = vpow2.f32 %v1260_v7  ;;  %781 = vrot.lane.b32.xlu0 %v729_v8, %s1381_s28  ;;  %785 = vrot.lane.b32.xlu2 %v735_v6, %s1381_s28  ;;  %vm909_vm6 = vweird.f32 %v1311_v9 }
 0x285   : > { %vm910_vm9 = vmor %vm908_vm7, %vm909_vm6 }
 0x286   : > { %v905_v11 = vsub.f32 1.0, %v904_v10 }
 0x288   : > { %v906_v13 = vmul.f32 %v1311_v9, %v905_v11  ;;  %v768_v15 = vpop.permute.xlu2 %767 }
 0x289   : > { %v812_v16 = vsel %vm807_vm5, %v1568_v26, %v768_v15  ;;  %v740_v18 = vpop.f32.mrf.mxu3 }
 0x28a   : > { %v1313_v19 = vpop.eup %1312  ;;  %v907_v21 = vadd.f32 %v1311_v9, %v906_v13  ;;  %v1264_v25 = vmul.f32 -1.442695, %v812_v16  ;;  %v741_v27 = vadd.f32 %v1664_v24, %v740_v18 }
 0x28b   : > { %v872_v30 = vadd.f32 1.0, %v1313_v19 }
 0x28c   : > { %v911_v26 = vsel %vm910_vm9, %v1311_v9, %v907_v21  ;;  %1314 = vpow2.f32 %v1264_v25  ;;  %787 = vrot.lane.b32.xlu0 %v738_v22, %s1381_s28  ;;  %789 = vrot.lane.b32.xlu1 %v741_v27, %s1381_s28 }
 0x28d   : > { %v916_v31 = vsel %vm913_vm10, %v915_v28, %v911_v26  ;;  %1316 = vrcp.f32 %v872_v30  ;;  %v899_v43 = vand.u32 2147483648, %v872_v30  ;;  %v897_v45 = vand.u32 2147483647, %v872_v30 }
 0x28e   : > { %1130 = vst.msk [vmem:[%s1707_s30 + $0x8] sm:$0xff] %vm1128_vm8, %v916_v31  ;;  %vm893_vm12 = vweird.f32 %v872_v30 }
 0x28f   : > { %v900_v52 = vor.u32 1.1754944e-38, %v899_v43  ;;  %vm898_vm14 = vcmp.eq.f32.partialorder %v897_v45, 8.507059e+37 }
 0x290   : > { %v764_v24 = vpop.permute.xlu0 %763 }
 0x291   : > { %v810_v33 = vsel %vm807_vm5, %v1558_v20, %v764_v24 }
 0x292   : > { %v1315_v34 = vpop.eup %1314  ;;  %v1262_v36 = vmul.f32 -1.442695, %v810_v33 }
 0x293   : > { %v1317_v37 = vpop.eup %1316  ;;  %v876_v39 = vadd.f32 1.0, %v1315_v34 }
 0x294   : > { %v889_v40 = vmul.f32 %v1317_v37, %v872_v30  ;;  %1318 = vpow2.f32 %v1262_v36  ;;  %vm894_vm11 = vweird.f32 %v1317_v37 }
 0x295   : > { %1320 = vrcp.f32 %v876_v39  ;;  %vm895_vm13 = vmor %vm893_vm12, %vm894_vm11  ;;  %v959_v61 = vand.u32 2147483648, %v876_v39  ;;  %vm953_vm0 = vweird.f32 %v876_v39 }
 0x296   : > { %v890_v42 = vsub.f32 1.0, %v889_v40 }
 0x297   : > { %v960_v6 = vor.u32 1.1754944e-38, %v959_v61 }
 0x298   : > { %v891_v44 = vmul.f32 %v1317_v37, %v890_v42  ;;  %v766_v46 = vpop.permute.xlu1 %765 }
 0x299   : > { %v811_v47 = vsel %vm807_vm5, %v1563_v23, %v766_v46  ;;  %v957_v23 = vand.u32 2147483647, %v876_v39 }
 0x29a   : > { %v1319_v48 = vpop.eup %1318  ;;  %v892_v49 = vadd.f32 %v1317_v37, %v891_v44  ;;  %v1263_v20 = vmul.f32 -1.442695, %v811_v47 }
 0x29b   : > { %v1321_v50 = vpop.eup %1320  ;;  %v874_v53 = vadd.f32 1.0, %v1319_v48  ;;  %vm958_vm2 = vcmp.eq.f32.partialorder %v957_v23, 8.507059e+37 }
 0x29c   : > { %v896_v55 = vsel %vm895_vm13, %v1317_v37, %v892_v49  ;;  %v949_v57 = vmul.f32 %v1321_v50, %v876_v39  ;;  %1322 = vpow2.f32 %v1263_v20  ;;  %vm954_vm15 = vweird.f32 %v1321_v50 }
 0x29d   : > { %v901_v58 = vsel %vm898_vm14, %v900_v52, %v896_v55  ;;  %1324 = vrcp.f32 %v874_v53  ;;  %vm955_vm1 = vmor %vm953_vm0, %vm954_vm15  ;;  %v929_v12 = vand.u32 2147483648, %v874_v53  ;;  %vm923_vm4 = vweird.f32 %v874_v53 }
 0x29e   : > { %1129 = vst.msk [vmem:[%s1707_s30] sm:$0xff] %vm1128_vm8, %v901_v58  ;;  %v950_v59 = vsub.f32 1.0, %v949_v57 }
 0x29f   : > { %v930_v22 = vor.u32 1.1754944e-38, %v929_v12 }
 0x2a0   : > { %v951_v63 = vmul.f32 %v1321_v50, %v950_v59  ;;  %v774_v0 = vpop.permute.xlu2 %773 }
 0x2a1   : > { %v815_v1 = vsel %vm807_vm5, %v1583_v35, %v774_v0  ;;  %v927_v35 = vand.u32 2147483647, %v874_v53 }
 0x2a2   : > { %v1323_v2 = vpop.eup %1322  ;;  %v952_v17 = vadd.f32 %v1321_v50, %v951_v63  ;;  %v1267_v4 = vmul.f32 -1.442695, %v815_v1 }
 0x2a3   : > { %v1325_v5 = vpop.eup %1324  ;;  %v875_v7 = vadd.f32 1.0, %v1323_v2  ;;  %vm928_vm7 = vcmp.eq.f32.partialorder %v927_v35, 8.507059e+37 }
 0x2a4   : > { %v956_v8 = vsel %vm955_vm1, %v1321_v50, %v952_v17  ;;  %v919_v9 = vmul.f32 %v1325_v5, %v874_v53  ;;  %1326 = vpow2.f32 %v1267_v4  ;;  %vm924_vm3 = vweird.f32 %v1325_v5 }
 0x2a5   : > { %v961_v10 = vsel %vm958_vm2, %v960_v6, %v956_v8  ;;  %1328 = vrcp.f32 %v875_v7  ;;  %vm925_vm6 = vmor %vm923_vm4, %vm924_vm3  ;;  %v944_v31 = vand.u32 2147483648, %v875_v7  ;;  %vm938_vm10 = vweird.f32 %v875_v7 }
 0x2a6   : > { %1133 = vst.msk [vmem:[%s1707_s30 + $0x20] sm:$0xff] %vm1128_vm8, %v961_v10  ;;  %v920_v11 = vsub.f32 1.0, %v919_v9 }
 0x2a7   : > { %v945_v42 = vor.u32 1.1754944e-38, %v944_v31 }
 0x2a8   : > { %v921_v13 = vmul.f32 %v1325_v5, %v920_v11  ;;  %v770_v14 = vpop.permute.xlu0 %769 }
 0x2a9   : > { %v813_v15 = vsel %vm807_vm5, %v1573_v29, %v770_v14  ;;  %v942_v29 = vand.u32 2147483647, %v875_v7 }
 0x2aa   : > { %v1327_v16 = vpop.eup %1326  ;;  %v922_v18 = vadd.f32 %v1325_v5, %v921_v13  ;;  %v1265_v19 = vmul.f32 -1.442695, %v813_v15 }
 0x2ab   : > { %v1329_v21 = vpop.eup %1328  ;;  %v879_v25 = vadd.f32 1.0, %v1327_v16  ;;  %vm943_vm12 = vcmp.eq.f32.partialorder %v942_v29, 8.507059e+37 }
 0x2ac   : > { %v926_v27 = vsel %vm925_vm6, %v1325_v5, %v922_v18  ;;  %v934_v28 = vmul.f32 %v1329_v21, %v875_v7  ;;  %1330 = vpow2.f32 %v1265_v19  ;;  %vm939_vm9 = vweird.f32 %v1329_v21 }
 0x2ad   : > { %v931_v30 = vsel %vm928_vm7, %v930_v22, %v926_v27  ;;  %1332 = vrcp.f32 %v879_v25  ;;  %vm940_vm11 = vmor %vm938_vm10, %vm939_vm9  ;;  %v1004_v48 = vand.u32 2147483648, %v879_v25  ;;  %v1002_v49 = vand.u32 2147483647, %v879_v25 }
 0x2ae   : > { %1131 = vst.msk [vmem:[%s1707_s30 + $0x10] sm:$0xff] %vm1128_vm8, %v931_v30  ;;  %v935_v26 = vsub.f32 1.0, %v934_v28  ;;  %vm998_vm14 = vweird.f32 %v879_v25 }
 0x2af   : > { %v1005_v53 = vor.u32 1.1754944e-38, %v1004_v48  ;;  %vm1003_vm0 = vcmp.eq.f32.partialorder %v1002_v49, 8.507059e+37 }
 0x2b0   : > { %v936_v24 = vmul.f32 %v1329_v21, %v935_v26  ;;  %v772_v33 = vpop.permute.xlu1 %771 }
 0x2b1   : > { %v814_v34 = vsel %vm807_vm5, %v1578_v32, %v772_v33 }
 0x2b2   : > { %v1331_v36 = vpop.eup %1330  ;;  %v937_v37 = vadd.f32 %v1329_v21, %v936_v24  ;;  %v1266_v39 = vmul.f32 -1.442695, %v814_v34 }
 0x2b3   : > { %v1333_v40 = vpop.eup %1332  ;;  %v877_v43 = vadd.f32 1.0, %v1331_v36 }
 0x2b4   : > { %v941_v44 = vsel %vm940_vm11, %v1329_v21, %v937_v37  ;;  %v994_v45 = vmul.f32 %v1333_v40, %v879_v25  ;;  %1334 = vpow2.f32 %v1266_v39  ;;  %vm999_vm13 = vweird.f32 %v1333_v40 }
 0x2b5   : > { %v946_v46 = vsel %vm943_vm12, %v945_v42, %v941_v44  ;;  %1336 = vrcp.f32 %v877_v43  ;;  %vm1000_vm15 = vmor %vm998_vm14, %vm999_vm13  ;;  %v974_v63 = vand.u32 2147483648, %v877_v43  ;;  %v972_v0 = vand.u32 2147483647, %v877_v43 }
 0x2b6   : > { %1132 = vst.msk [vmem:[%s1707_s30 + $0x18] sm:$0xff] %vm1128_vm8, %v946_v46  ;;  %v995_v47 = vsub.f32 1.0, %v994_v45  ;;  %vm968_vm2 = vweird.f32 %v877_v43 }
 0x2b7   : > { %v975_v6 = vor.u32 1.1754944e-38, %v974_v63  ;;  %vm973_vm4 = vcmp.eq.f32.partialorder %v972_v0, 8.507059e+37 }
 0x2b8   : > { %v996_v32 = vmul.f32 %v1333_v40, %v995_v47 }
 0x2ba   : > { %v1335_v20 = vpop.eup %1334  ;;  %v997_v50 = vadd.f32 %v1333_v40, %v996_v32 }
 0x2bb   : > { %v1337_v52 = vpop.eup %1336  ;;  %v878_v55 = vadd.f32 1.0, %v1335_v20 }
 0x2bc   : > { %v1001_v57 = vsel %vm1000_vm15, %v1333_v40, %v997_v50  ;;  %v964_v58 = vmul.f32 %v1337_v52, %v877_v43  ;;  %vm969_vm1 = vweird.f32 %v1337_v52 }
 0x2bd   : > { %v1006_v59 = vsel %vm1003_vm0, %v1005_v53, %v1001_v57  ;;  %1338 = vrcp.f32 %v878_v55  ;;  %vm970_vm3 = vmor %vm968_vm2, %vm969_vm1  ;;  %v989_v11 = vand.u32 2147483648, %v878_v55  ;;  %v987_v13 = vand.u32 2147483647, %v878_v55 }
 0x2be   : > { %1136 = vst.msk [vmem:[%s1707_s30 + $0x38] sm:$0xff] %vm1128_vm8, %v1006_v59  ;;  %v965_v61 = vsub.f32 1.0, %v964_v58  ;;  %vm983_vm7 = vweird.f32 %v878_v55 }
 0x2bf   : > { %v990_v18 = vor.u32 1.1754944e-38, %v989_v11  ;;  %vm988_vm10 = vcmp.eq.f32.partialorder %v987_v13, 8.507059e+37 }
 0x2c0   : > { %v966_v23 = vmul.f32 %v1337_v52, %v965_v61  ;;  %v776_v1 = vpop.permute.xlu0 %775 }
 0x2c1   : > { %v816_v2 = vsel %vm807_vm5, %v1588_v38, %v776_v1 }
 0x2c2   : > { %v967_v17 = vadd.f32 %v1337_v52, %v966_v23  ;;  %v1268_v4 = vmul.f32 -1.442695, %v816_v2 }
 0x2c3   : > { %v1339_v5 = vpop.eup %1338 }
 0x2c4   : > { %v971_v7 = vsel %vm970_vm3, %v1337_v52, %v967_v17  ;;  %v979_v8 = vmul.f32 %v1339_v5, %v878_v55  ;;  %1340 = vpow2.f32 %v1268_v4  ;;  %vm984_vm6 = vweird.f32 %v1339_v5 }
 0x2c5   : > { %v976_v9 = vsel %vm973_vm4, %v975_v6, %v971_v7  ;;  %vm985_vm9 = vmor %vm983_vm7, %vm984_vm6 }
 0x2c6   : > { %1134 = vst.msk [vmem:[%s1707_s30 + $0x28] sm:$0xff] %vm1128_vm8, %v976_v9  ;;  %v980_v10 = vsub.f32 1.0, %v979_v8 }
 0x2c8   : > { %v981_v12 = vmul.f32 %v1339_v5, %v980_v10  ;;  %v778_v38 = vpop.permute.xlu1 %777 }
 0x2c9   : > { %v817_v35 = vsel %vm807_vm5, %v1593_v41, %v778_v38 }
 0x2ca   : > { %v1341_v14 = vpop.eup %1340  ;;  %v982_v15 = vadd.f32 %v1339_v5, %v981_v12  ;;  %v1269_v16 = vmul.f32 -1.442695, %v817_v35 }
 0x2cb   : > { %v880_v19 = vadd.f32 1.0, %v1341_v14 }
 0x2cc   : > { %v986_v21 = vsel %vm985_vm9, %v1339_v5, %v982_v15  ;;  %1342 = vpow2.f32 %v1269_v16 }
 0x2cd   : > { %v991_v22 = vsel %vm988_vm10, %v990_v18, %v986_v21  ;;  %1344 = vrcp.f32 %v880_v19  ;;  %v1019_v31 = vand.u32 2147483648, %v880_v19  ;;  %v1017_v33 = vand.u32 2147483647, %v880_v19 }
 0x2ce   : > { %1135 = vst.msk [vmem:[%s1707_s30 + $0x30] sm:$0xff] %vm1128_vm8, %v991_v22  ;;  %vm1013_vm12 = vweird.f32 %v880_v19 }
 0x2cf   : > { %v1020_v39 = vor.u32 1.1754944e-38, %v1019_v31  ;;  %vm1018_vm14 = vcmp.eq.f32.partialorder %v1017_v33, 8.507059e+37 }
 0x2d2   : > { %v1343_v25 = vpop.eup %1342 }
 0x2d3   : > { %v1345_v27 = vpop.eup %1344  ;;  %v881_v28 = vadd.f32 1.0, %v1343_v25 }
 0x2d4   : > { %v1009_v30 = vmul.f32 %v1345_v27, %v880_v19  ;;  %vm1014_vm11 = vweird.f32 %v1345_v27 }
 0x2d5   : > { %1346 = vrcp.f32 %v881_v28  ;;  %vm1015_vm13 = vmor %vm1013_vm12, %vm1014_vm11  ;;  %v1034_v46 = vand.u32 2147483648, %v881_v28  ;;  %v1032_v32 = vand.u32 2147483647, %v881_v28  ;;  %vm1028_vm0 = vweird.f32 %v881_v28 }
 0x2d6   : > { %v1010_v41 = vsub.f32 1.0, %v1009_v30  ;;  %v780_v26 = vpop.permute.xlu2 %779 }
 0x2d7   : > { %v818_v24 = vsel %vm807_vm5, %v1624_v54, %v780_v26  ;;  %v1035_v52 = vor.u32 1.1754944e-38, %v1034_v46  ;;  %vm1033_vm2 = vcmp.eq.f32.partialorder %v1032_v32, 8.507059e+37 }
 0x2d8   : > { %v1011_v29 = vmul.f32 %v1345_v27, %v1010_v41  ;;  %v1270_v34 = vmul.f32 -1.442695, %v818_v24 }
 0x2da   : > { %v1012_v36 = vadd.f32 %v1345_v27, %v1011_v29  ;;  %1348 = vpow2.f32 %v1270_v34 }
 0x2db   : > { %v1347_v37 = vpop.eup %1346 }
 0x2dc   : > { %v1016_v40 = vsel %vm1015_vm13, %v1345_v27, %v1012_v36  ;;  %v1024_v42 = vmul.f32 %v1347_v37, %v881_v28  ;;  %vm1029_vm15 = vweird.f32 %v1347_v37 }
 0x2dd   : > { %v1021_v43 = vsel %vm1018_vm14, %v1020_v39, %v1016_v40  ;;  %vm1030_vm1 = vmor %vm1028_vm0, %vm1029_vm15 }
 0x2de   : > { %1137 = vst.msk [vmem:[%s1707_s30 + $0x40] sm:$0xff] %vm1128_vm8, %v1021_v43  ;;  %v1025_v44 = vsub.f32 1.0, %v1024_v42  ;;  %v786_v45 = vpop.permute.xlu2 %785 }
 0x2df   : > { %v821_v54 = vsel %vm807_vm5, %v1627_v56, %v786_v45 }
 0x2e0   : > { %v1349_v47 = vpop.eup %1348  ;;  %v1026_v48 = vmul.f32 %v1347_v37, %v1025_v44  ;;  %v1273_v49 = vmul.f32 -1.442695, %v821_v54 }
 0x2e1   : > { %v882_v20 = vadd.f32 1.0, %v1349_v47 }
 0x2e2   : > { %v1027_v50 = vadd.f32 %v1347_v37, %v1026_v48  ;;  %1350 = vpow2.f32 %v1273_v49 }
 0x2e3   : > { %1352 = vrcp.f32 %v882_v20  ;;  %v1049_v1 = vand.u32 2147483648, %v882_v20  ;;  %v1047_v17 = vand.u32 2147483647, %v882_v20  ;;  %vm1043_vm4 = vweird.f32 %v882_v20 }
 0x2e4   : > { %v1031_v53 = vsel %vm1030_vm1, %v1347_v37, %v1027_v50 }
 0x2e5   : > { %v1036_v55 = vsel %vm1033_vm2, %v1035_v52, %v1031_v53  ;;  %v1050_v7 = vor.u32 1.1754944e-38, %v1049_v1  ;;  %vm1048_vm7 = vcmp.eq.f32.partialorder %v1047_v17, 8.507059e+37 }
 0x2e6   : > { %1138 = vst.msk [vmem:[%s1707_s30 + $0x48] sm:$0xff] %vm1128_vm8, %v1036_v55  ;;  %v784_v57 = vpop.permute.xlu1 %783 }
 0x2e7   : > { %v820_v56 = vsel %vm807_vm5, %v1619_v51, %v784_v57 }
 0x2e8   : > { %v1351_v58 = vpop.eup %1350  ;;  %v1272_v59 = vmul.f32 -1.442695, %v820_v56 }
 0x2e9   : > { %v1353_v61 = vpop.eup %1352  ;;  %v885_v63 = vadd.f32 1.0, %v1351_v58 }
 0x2ea   : > { %v1039_v23 = vmul.f32 %v1353_v61, %v882_v20  ;;  %1354 = vpow2.f32 %v1272_v59  ;;  %vm1044_vm3 = vweird.f32 %v1353_v61 }
 0x2eb   : > { %1356 = vrcp.f32 %v885_v63  ;;  %vm1045_vm6 = vmor %vm1043_vm4, %vm1044_vm3  ;;  %v1094_v12 = vand.u32 2147483648, %v885_v63  ;;  %v1092_v38 = vand.u32 2147483647, %v885_v63  ;;  %vm1088_vm10 = vweird.f32 %v885_v63 }
 0x2ec   : > { %v1040_v0 = vsub.f32 1.0, %v1039_v23 }
 0x2ed   : > { %v1095_v19 = vor.u32 1.1754944e-38, %v1094_v12  ;;  %vm1093_vm12 = vcmp.eq.f32.partialorder %v1092_v38, 8.507059e+37 }
 0x2ee   : > { %v1041_v2 = vmul.f32 %v1353_v61, %v1040_v0 }
 0x2f0   : > { %v1355_v4 = vpop.eup %1354  ;;  %v1042_v5 = vadd.f32 %v1353_v61, %v1041_v2 }
 0x2f1   : > { %v1357_v6 = vpop.eup %1356  ;;  %v884_v51 = vadd.f32 1.0, %v1355_v4 }
 0x2f2   : > { %v1046_v8 = vsel %vm1045_vm6, %v1353_v61, %v1042_v5  ;;  %v1084_v9 = vmul.f32 %v1357_v6, %v885_v63  ;;  %vm1089_vm9 = vweird.f32 %v1357_v6 }
 0x2f3   : > { %v1051_v10 = vsel %vm1048_vm7, %v1050_v7, %v1046_v8  ;;  %1358 = vrcp.f32 %v884_v51  ;;  %vm1090_vm11 = vmor %vm1088_vm10, %vm1089_vm9  ;;  %v1079_v28 = vand.u32 2147483648, %v884_v51  ;;  %v1077_v41 = vand.u32 2147483647, %v884_v51 }
 0x2f4   : > { %1139 = vst.msk [vmem:[%s1707_s30 + $0x50] sm:$0xff] %vm1128_vm8, %v1051_v10  ;;  %v1085_v11 = vsub.f32 1.0, %v1084_v9  ;;  %vm1073_vm14 = vweird.f32 %v884_v51 }
 0x2f5   : > { %v1080_v37 = vor.u32 1.1754944e-38, %v1079_v28  ;;  %vm1078_vm0 = vcmp.eq.f32.partialorder %v1077_v41, 8.507059e+37 }
 0x2f6   : > { %v1086_v13 = vmul.f32 %v1357_v6, %v1085_v11  ;;  %v782_v35 = vpop.permute.xlu0 %781 }
 0x2f7   : > { %v819_v14 = vsel %vm807_vm5, %v1634_v60, %v782_v35 }
 0x2f8   : > { %v1087_v15 = vadd.f32 %v1357_v6, %v1086_v13  ;;  %v1271_v16 = vmul.f32 -1.442695, %v819_v14 }
 0x2f9   : > { %v1359_v18 = vpop.eup %1358 }
 0x2fa   : > { %v1091_v21 = vsel %vm1090_vm11, %v1357_v6, %v1087_v15  ;;  %v1069_v22 = vmul.f32 %v1359_v18, %v884_v51  ;;  %1360 = vpow2.f32 %v1271_v16  ;;  %vm1074_vm13 = vweird.f32 %v1359_v18 }
 0x2fb   : > { %v1096_v25 = vsel %vm1093_vm12, %v1095_v19, %v1091_v21  ;;  %vm1075_vm15 = vmor %vm1073_vm14, %vm1074_vm13 }
 0x2fc   : > { %1142 = vst.msk [vmem:[%s1707_s30 + $0x68] sm:$0xff] %vm1128_vm8, %v1096_v25  ;;  %v1070_v27 = vsub.f32 1.0, %v1069_v22 }
 0x2fe   : > { %v1071_v30 = vmul.f32 %v1359_v18, %v1070_v27  ;;  %v790_v26 = vpop.permute.xlu1 %789  ;;  %v788_v60 = vpop.permute.xlu0 %787 }
 0x2ff   : > { %v823_v31 = vsel %vm807_vm5, %v1645_v3, %v790_v26  ;;  %v822_v24 = vsel %vm807_vm5, %v1637_v62, %v788_v60 }
 0x300   : > { %v1361_v29 = vpop.eup %1360  ;;  %v1072_v33 = vadd.f32 %v1359_v18, %v1071_v30  ;;  %v1275_v34 = vmul.f32 -1.442695, %v823_v31  ;;  %v1274_v36 = vmul.f32 -1.442695, %v822_v24 }
 0x301   : > { %v883_v39 = vadd.f32 1.0, %v1361_v29 }
 0x302   : > { %v1076_v40 = vsel %vm1075_vm15, %v1359_v18, %v1072_v33  ;;  %1362 = vpow2.f32 %v1275_v34 }
 0x303   : > { %v1081_v42 = vsel %vm1078_vm0, %v1080_v37, %v1076_v40  ;;  %1364 = vrcp.f32 %v883_v39  ;;  %v1064_v47 = vand.u32 2147483648, %v883_v39  ;;  %v1062_v32 = vand.u32 2147483647, %v883_v39 }
 0x304   : > { %1141 = vst.msk [vmem:[%s1707_s30 + $0x60] sm:$0xff] %vm1128_vm8, %v1081_v42  ;;  %1366 = vpow2.f32 %v1274_v36  ;;  %vm1058_vm1 = vweird.f32 %v883_v39 }
 0x305   : > { %v1065_v50 = vor.u32 1.1754944e-38, %v1064_v47  ;;  %vm1063_vm3 = vcmp.eq.f32.partialorder %v1062_v32, 8.507059e+37 }
 0x308   : > { %v1363_v3 = vpop.eup %1362 }
 0x309   : > { %v1365_v43 = vpop.eup %1364  ;;  %v887_v44 = vadd.f32 1.0, %v1363_v3 }
 0x30a   : > { %v1367_v62 = vpop.eup %1366  ;;  %v1054_v45 = vmul.f32 %v1365_v43, %v883_v39  ;;  %vm1059_vm5 = vweird.f32 %v1365_v43 }
 0x30b   : > { %1368 = vrcp.f32 %v887_v44  ;;  %v886_v54 = vadd.f32 1.0, %v1367_v62  ;;  %vm1060_vm2 = vmor %vm1058_vm1, %vm1059_vm5  ;;  %v1124_v58 = vand.u32 2147483648, %v887_v44  ;;  %v1122_v63 = vand.u32 2147483647, %v887_v44 }
 0x30c   : > { %v1055_v46 = vsub.f32 1.0, %v1054_v45  ;;  %vm1118_vm6 = vweird.f32 %v887_v44 }
 0x30d   : > { %1370 = vrcp.f32 %v886_v54  ;;  %v1109_v1 = vand.u32 2147483648, %v886_v54  ;;  %v1125_v2 = vor.u32 1.1754944e-38, %v1124_v58  ;;  %v1107_v4 = vand.u32 2147483647, %v886_v54 }
 0x30e   : > { %v1056_v48 = vmul.f32 %v1365_v43, %v1055_v46  ;;  %vm1123_vm10 = vcmp.eq.f32.partialorder %v1122_v63, 8.507059e+37  ;;  %vm1103_vm11 = vweird.f32 %v886_v54 }
 0x30f   : > { %v1110_v51 = vor.u32 1.1754944e-38, %v1109_v1  ;;  %vm1108_vm13 = vcmp.eq.f32.partialorder %v1107_v4, 8.507059e+37 }
 0x310   : > { %v1057_v49 = vadd.f32 %v1365_v43, %v1056_v48 }
 0x311   : > { %v1369_v20 = vpop.eup %1368 }
 0x312   : > { %v1061_v52 = vsel %vm1060_vm2, %v1365_v43, %v1057_v49  ;;  %v1114_v53 = vmul.f32 %v1369_v20, %v887_v44  ;;  %vm1119_vm4 = vweird.f32 %v1369_v20 }
 0x313   : > { %v1066_v55 = vsel %vm1063_vm3, %v1065_v50, %v1061_v52  ;;  %v1371_v57 = vpop.eup %1370  ;;  %vm1120_vm7 = vmor %vm1118_vm6, %vm1119_vm4 }
 0x314   : > { %1140 = vst.msk [vmem:[%s1707_s30 + $0x58] sm:$0xff] %vm1128_vm8, %v1066_v55  ;;  %v1115_v56 = vsub.f32 1.0, %v1114_v53  ;;  %v1099_v59 = vmul.f32 %v1371_v57, %v886_v54  ;;  %vm1104_vm9 = vweird.f32 %v1371_v57 }
 0x315   : > { %vm1105_vm12 = vmor %vm1103_vm11, %vm1104_vm9 }
 0x316   : > { %v1116_v61 = vmul.f32 %v1369_v20, %v1115_v56  ;;  %v1100_v23 = vsub.f32 1.0, %v1099_v59 }
 0x318   : > { %v1117_v0 = vadd.f32 %v1369_v20, %v1116_v61  ;;  %v1101_v17 = vmul.f32 %v1371_v57, %v1100_v23 }
 0x31a   : > { %v1121_v5 = vsel %vm1120_vm7, %v1369_v20, %v1117_v0  ;;  %v1102_v7 = vadd.f32 %v1371_v57, %v1101_v17 }
 0x31b   : > { %v1126_v6 = vsel %vm1123_vm10, %v1125_v2, %v1121_v5 }
 0x31c   : > { %1144 = vst.msk [vmem:[%s1707_s30 + $0x78] sm:$0xff] %vm1128_vm8, %v1126_v6  ;;  %v1106_v8 = vsel %vm1105_vm12, %v1371_v57, %v1102_v7 }
 0x31d   : > { %v1111_v9 = vsel %vm1108_vm13, %v1110_v51, %v1106_v8 }
 0x31e   : > { %1143 = vst.msk [vmem:[%s1707_s30 + $0x70] sm:$0xff] %vm1128_vm8, %v1111_v9 }
 0x31f PF: > { %s19_s26 = sadd.s32 1, %s1378_s26  }
 0x320   : > { %p16_p4 = scmp.ge.s32.totalorder %s19_s26, 4  }
 0x322   :  { %18 = sbr.rel (!%p16_p4) target bundleno = 3 (0x3), region = 78 }

</bundles_post_ra>
